<compile_context>
chip_gen: v5e
topology: v5e:2x2
jax: 0.10.0
libtpu: 0.0.40
codegen_flags: <defaults>
</compile_context>

<pallas_src>
import functools

import numpy as np
import jax
import jax.numpy as jnp
from jax.experimental import pallas as pl
from jax.experimental.pallas import tpu as pltpu

_EPS = 1e-5
_VMEM = pl.BlockSpec(memory_space=pltpu.MemorySpace.VMEM)


# ---------------------------------------------------------------------------
# In-kernel building blocks (operate on traced values, lane-dense layout)
# ---------------------------------------------------------------------------
def _conv1x1_bn_relu(xs, w_oi, gamma, beta, count):
    """Fused 1x1 conv + BatchNorm(batch stats) + ReLU.

    xs:     list of per-image (Cin, HW) f32 values (HW is the lane dim, >=128).
    w_oi:   (Cout, Cin) f32 weight (PyTorch Conv2d 1x1 weight squeezed).
    gamma/beta: (Cout, 1) f32 BN affine parameters.
    count:  float, N*H*W (BN normalizer).
    Returns a list of per-image (Cout, HW) f32 values.
    """
    wb = w_oi.astype(jnp.bfloat16)  # bf16 operands -> MXU, f32 accumulate
    ys = [jnp.dot(wb, x.astype(jnp.bfloat16), preferred_element_type=jnp.float32)
          for x in xs]

    # Single-pass batch statistics: per-channel sum and sum of squares.
    s = ys[0].sum(axis=1, keepdims=True)
    ss = (ys[0] * ys[0]).sum(axis=1, keepdims=True)
    for y in ys[1:]:
        s = s + y.sum(axis=1, keepdims=True)
        ss = ss + (y * y).sum(axis=1, keepdims=True)
    inv_cnt = 1.0 / count
    mean = s * inv_cnt
    var = ss * inv_cnt - mean * mean          # biased variance (PyTorch BN)

    scale = gamma * jax.lax.rsqrt(var + _EPS)  # (Cout, 1)
    shift = beta - mean * scale
    return [jnp.maximum(y * scale + shift, 0.0) for y in ys]


def _shifted_taps(x, H, W, K):
    """Yield (tap_index, shifted, valid) for every kxk tap on one image.

    x is (C, H*W).  The spatial offset (dy-p, dx-p) is realized as a single
    pltpu.roll by (dy-p)*W + (dx-p) along the flattened lane axis (XLU op);
    `valid` masks positions whose source pixel falls outside the image
    (zero padding / excluded from the pool window).
    """
    C, HW = x.shape
    p = (K - 1) // 2
    flat = jax.lax.broadcasted_iota(jnp.int32, (C, HW), 1)
    row = flat // W
    col = flat - row * W
    for dy in range(K):
        for dx in range(K):
            oh, ow = dy - p, dx - p
            delta = oh * W + ow                       # flat-index offset
            if delta == 0:
                shifted = x
            else:
                # shifted[m] = x[(m + delta) mod HW]; wrap-around is masked out.
                shifted = pltpu.roll(x, shift=(-delta) % HW, axis=1)
            valid = ((row + oh >= 0) & (row + oh < H) &
                     (col + ow >= 0) & (col + ow < W))
            yield dy * K + dx, shifted, valid


def _depthwise(x, wdw_ref, H, W, K):
    """Depthwise kxk conv (zero padding) on one image.  x: (C, HW)."""
    acc = jnp.zeros_like(x)
    for t, shifted, valid in _shifted_taps(x, H, W, K):
        acc = acc + jnp.where(valid, shifted, 0.0) * wdw_ref[t]   # (C,1) weight
    return acc


def _pool3x3(x, H, W, pool_type):
    """3x3 stride-1 pad-1 pooling on one image.  x: (C, HW)."""
    if pool_type == "max":
        acc = jnp.full(x.shape, -jnp.inf, jnp.float32)
        for _, shifted, valid in _shifted_taps(x, H, W, 3):
            acc = jnp.maximum(acc, jnp.where(valid, shifted, -jnp.inf))
        return acc
    # 'avg': PyTorch default count_include_pad=True -> always divide by 9.
    acc = jnp.zeros_like(x)
    for _, shifted, valid in _shifted_taps(x, H, W, 3):
        acc = acc + jnp.where(valid, shifted, 0.0)
    return acc * (1.0 / 9.0)


# ---------------------------------------------------------------------------
# One fused kernel per branch
# ---------------------------------------------------------------------------
def _branch_kernel(cfg, *refs):
    """Whole-branch fused kernel.

    refs layout (all VMEM-resident):
      conv(non-sep): x, w1, g1, b1, w2, g2, b2, *skips, out
      conv(sep):     x, w1, g1, b1, w_dw, w2, g2, b2, *skips, out
      pool:          x, w1, g1, b1, *skips, out
    """
    N, H, W = cfg["N"], cfg["H"], cfg["W"]
    n_skip = cfg["n_skip"]
    btype = cfg["type"]
    HW = H * W

    it = iter(refs)
    x_ref = next(it)
    w1_ref, g1_ref, b1_ref = next(it), next(it), next(it)
    wdw_ref = w2_ref = g2_ref = b2_ref = None
    if btype == "conv":
        if cfg["sep"]:
            wdw_ref = next(it)
        w2_ref, g2_ref, b2_ref = next(it), next(it), next(it)
    skip_refs = [next(it) for _ in range(n_skip)]
    o_ref = next(it)

    count = float(N * HW)
    xs = [x_ref[n] for n in range(N)]                     # per-image (C, HW)

    # Stage 1: 1x1 conv + BN + ReLU
    h1 = _conv1x1_bn_relu(xs, w1_ref[...], g1_ref[...], b1_ref[...], count)

    # Stage 2 / 3
    if btype == "conv":
        if cfg["sep"]:
            mid = [_depthwise(h, wdw_ref, H, W, cfg["k"]) for h in h1]
        else:
            mid = h1
        out = _conv1x1_bn_relu(mid, w2_ref[...], g2_ref[...], b2_ref[...], count)
    else:
        out = [_pool3x3(h, H, W, cfg["pool"]) for h in h1]

    # Epilogue: fused skip connections + lane-dense store.
    for n in range(N):
        o = out[n]
        for s_ref in skip_refs:
            o = o + s_ref[n]
        o_ref[n] = o


# ---------------------------------------------------------------------------
# Parameter init (deterministic, synthetic — no checkpoint)
# ---------------------------------------------------------------------------
def init_params(key, C):
    keys = iter(jax.random.split(key, 48))

    def conv_w(cout, cin):                      # (Cout, Cin), like PyTorch 1x1 conv
        return 0.3 * jax.random.normal(next(keys), (cout, cin), jnp.float32)

    def bn(c):
        g = 1.0 + 0.1 * jax.random.normal(next(keys), (c,), jnp.float32)
        b = 0.05 * jax.random.normal(next(keys), (c,), jnp.float32)
        return g, b

    params = []
    for kern in (3, 5):                          # branch1, branch2: plain ConvBranch
        g1, b1 = bn(C)
        g2, b2 = bn(C)
        params.append(dict(type="conv", sep=False, k=kern,
                           w1=conv_w(C, C), g1=g1, b1=b1,
                           w2=conv_w(C, C), g2=g2, b2=b2))
    for kern in (3, 5):                          # branch3, branch4: separable
        g1, b1 = bn(C)
        g2, b2 = bn(C)
        w_dw = 0.2 * jax.random.normal(next(keys), (kern * kern, C, 1), jnp.float32)
        params.append(dict(type="conv", sep=True, k=kern,
                           w1=conv_w(C, C), g1=g1, b1=b1,
                           w_dw=w_dw, w2=conv_w(C, C), g2=g2, b2=b2))
    for pt in ("max", "avg"):                    # branch5 (max), branch6 (avg)
        g1, b1 = bn(C)
        params.append(dict(type="pool", pool=pt, w1=conv_w(C, C), g1=g1, b1=b1))
    return params


# ---------------------------------------------------------------------------
# SharedEnasLayer.forward
# ---------------------------------------------------------------------------
def shared_enas_layer_forward(x_nchw, config, prev_outputs_nchw, params_list,
                              layer_id):
    branch_id = config[0]
    skip_connections = config[1] if 1 < layer_id else []
    assert branch_id in range(0, 6), ("branch_id not in range(0,6), ", branch_id)

    # Same (negative-index capable) selection as PyTorch: branches[branch_id - 1]
    p = params_list[branch_id - 1]

    n, c, H, W = x_nchw.shape
    HW = H * W
    # Free reshape: NCHW -> (N, C, H*W).  No XLA transpose / pad anywhere.
    x3 = x_nchw.reshape(n, c, HW).astype(jnp.float32)

    # Selected skip inputs become extra kernel operands (fused into epilogue).
    # (Guarded on len(skip_connections); the PyTorch code would IndexError if
    #  layer_id <= 1 while prev_outputs is non-empty.)
    skips = [prev_outputs_nchw[i].reshape(n, c, HW).astype(jnp.float32)
             for i in range(len(prev_outputs_nchw))
             if i < len(skip_connections) and skip_connections[i] == 1]

    cfg = dict(type=p["type"], sep=p.get("sep", False), k=p.get("k", 3),
               pool=p.get("pool", None), N=n, H=H, W=W, n_skip=len(skips))

    operands = [x3, p["w1"], p["g1"].reshape(c, 1), p["b1"].reshape(c, 1)]
    if p["type"] == "conv":
        if p["sep"]:
            operands.append(p["w_dw"])                         # (K*K, C, 1)
        operands += [p["w2"], p["g2"].reshape(c, 1), p["b2"].reshape(c, 1)]
    operands += skips

    out3 = pl.pallas_call(
        functools.partial(_branch_kernel, cfg),
        out_shape=jax.ShapeDtypeStruct((n, c, HW), jnp.float32),
        in_specs=[_VMEM] * len(operands),
        out_specs=_VMEM,
    )(*operands)

    return out3.reshape(n, c, H, W)    # free reshape back to NCHW


# ---------------------------------------------------------------------------
# Pure-JAX reference (NCHW) for correctness checking
# ---------------------------------------------------------------------------
def _ref_conv1x1_bn_relu(x, w_oi, gamma, beta):
    y = jnp.einsum("oi,nihw->nohw", w_oi.astype(jnp.bfloat16),
                   x.astype(jnp.bfloat16), preferred_element_type=jnp.float32)
    mean = jnp.mean(y, axis=(0, 2, 3), keepdims=True)
    var = jnp.var(y, axis=(0, 2, 3), keepdims=True)           # biased
    yn = (y - mean) * jax.lax.rsqrt(var + _EPS)
    g = gamma.reshape(1, -1, 1, 1)
    b = beta.reshape(1, -1, 1, 1)
    return jnp.maximum(yn * g + b, 0.0)


def _ref_depthwise(x, w_dw, k):
    p = (k - 1) // 2
    H, W = x.shape[2], x.shape[3]
    xp = jnp.pad(x, ((0, 0), (0, 0), (p, p), (p, p)))
    out = jnp.zeros_like(x)
    for dy in range(k):
        for dx in range(k):
            w = w_dw[dy * k + dx, :, 0].reshape(1, -1, 1, 1)
            out = out + xp[:, :, dy:dy + H, dx:dx + W] * w
    return out


def _ref_pool(x, pool_type):
    H, W = x.shape[2], x.shape[3]
    if pool_type == "max":
        xp = jnp.pad(x, ((0, 0), (0, 0), (1, 1), (1, 1)),
                     constant_values=-jnp.inf)
        out = jnp.full_like(x, -jnp.inf)
        for dy in range(3):
            for dx in range(3):
                out = jnp.maximum(out, xp[:, :, dy:dy + H, dx:dx + W])
        return out
    xp = jnp.pad(x, ((0, 0), (0, 0), (1, 1), (1, 1)))
    out = jnp.zeros_like(x)
    for dy in range(3):
        for dx in range(3):
            out = out + xp[:, :, dy:dy + H, dx:dx + W]
    return out * (1.0 / 9.0)


def _ref_forward(x, config, prev_outputs, params_list, layer_id):
    branch_id = config[0]
    skip_connections = config[1] if 1 < layer_id else []
    p = params_list[branch_id - 1]
    out = _ref_conv1x1_bn_relu(x, p["w1"], p["g1"], p["b1"])
    if p["type"] == "conv":
        if p["sep"]:
            out = _ref_depthwise(out, p["w_dw"], p["k"])
        out = _ref_conv1x1_bn_relu(out, p["w2"], p["g2"], p["b2"])
    else:
        out = _ref_pool(out, p["pool"])
    for i in range(len(prev_outputs)):
        if i < len(skip_connections) and skip_connections[i] == 1:
            out = out + prev_outputs[i]
    return out


# ---------------------------------------------------------------------------
if __name__ == "__main__":
    key = jax.random.PRNGKey(0)
    k_x, k_p1, k_p2, k_params = jax.random.split(key, 4)

    # in_filters == out_filters (required by the module's second-conv path)
    N, C, H, W = 2, 8, 16, 16
    layer_id = 2            # > 1 so skip_connections are active

    x = jax.random.normal(k_x, (N, C, H, W), jnp.float32)
    prev_outputs = [
        jax.random.normal(k_p1, (N, C, H, W), jnp.float32),
        jax.random.normal(k_p2, (N, C, H, W), jnp.float32),
    ]
    params_list = init_params(k_params, C)

    # Exercise every branch type (+ PyTorch-style branch_id 0 -> last branch),
    # plus multi-skip and no-skip (layer_id <= 1) configurations.
    cases = [(bid, [1, 0], layer_id) for bid in (1, 2, 3, 4, 5, 0)]
    cases.append((3, [1, 1], layer_id))   # two skip connections
    cases.append((5, [1, 0], 1))          # layer_id <= 1 -> no skips used

    results = []
    for bid, skip_flags, lid in cases:
        config = [bid, skip_flags]
        out = shared_enas_layer_forward(x, config, prev_outputs, params_list, lid)
        out = jax.block_until_ready(out)
        assert out.shape == (N, C, H, W)
        ref = _ref_forward(x, config, prev_outputs, params_list, lid)
        # Loose tolerance only because of bf16 double-rounding of the
        # stage-2 matmul inputs; structural errors would be O(1).
        np.testing.assert_allclose(np.asarray(out), np.asarray(ref),
                                   rtol=5e-2, atol=5e-2)
        results.append(out)

    jax.block_until_ready(results)
    print("KERNEL_OK")
</pallas_src>

<mosaic_0001>
module attributes {stable_mosaic.version = 11 : i64} {
  func.func @_branch_kernel(%arg0: memref<2x8x256xf32, #tpu.memory_space<vmem>>, %arg1: memref<8x8xf32, #tpu.memory_space<vmem>>, %arg2: memref<8x1xf32, #tpu.memory_space<vmem>>, %arg3: memref<8x1xf32, #tpu.memory_space<vmem>>, %arg4: memref<8x8xf32, #tpu.memory_space<vmem>>, %arg5: memref<8x1xf32, #tpu.memory_space<vmem>>, %arg6: memref<8x1xf32, #tpu.memory_space<vmem>>, %arg7: memref<2x8x256xf32, #tpu.memory_space<vmem>>, %arg8: memref<2x8x256xf32, #tpu.memory_space<vmem>>) attributes {dimension_semantics = [], scalar_prefetch = 0 : i64, scratch_operands = 0 : i64, tpu.core_type = #tpu.core_type<tc>} {
    %c0 = arith.constant 0 : index
    %c0_0 = arith.constant 0 : index
    %c0_1 = arith.constant 0 : index
    %0 = vector.load %arg0[%c0, %c0_0, %c0_1] : memref<2x8x256xf32, #tpu.memory_space<vmem>>, vector<1x8x256xf32>
    %1 = vector.shape_cast %0 : vector<1x8x256xf32> to vector<8x256xf32>
    %c1 = arith.constant 1 : index
    %c0_2 = arith.constant 0 : index
    %c0_3 = arith.constant 0 : index
    %2 = vector.load %arg0[%c1, %c0_2, %c0_3] : memref<2x8x256xf32, #tpu.memory_space<vmem>>, vector<1x8x256xf32>
    %3 = vector.shape_cast %2 : vector<1x8x256xf32> to vector<8x256xf32>
    %c0_4 = arith.constant 0 : index
    %c0_5 = arith.constant 0 : index
    %4 = vector.load %arg1[%c0_4, %c0_5] : memref<8x8xf32, #tpu.memory_space<vmem>>, vector<8x8xf32>
    %c0_6 = arith.constant 0 : index
    %c0_7 = arith.constant 0 : index
    %5 = vector.load %arg2[%c0_6, %c0_7] : memref<8x1xf32, #tpu.memory_space<vmem>>, vector<8x1xf32>
    %c0_8 = arith.constant 0 : index
    %c0_9 = arith.constant 0 : index
    %6 = vector.load %arg3[%c0_8, %c0_9] : memref<8x1xf32, #tpu.memory_space<vmem>>, vector<8x1xf32>
    %7 = arith.truncf %4 : vector<8x8xf32> to vector<8x8xbf16>
    %8 = arith.truncf %1 : vector<8x256xf32> to vector<8x256xbf16>
    %cst = arith.constant dense<0.000000e+00> : vector<8x256xf32>
    %9 = tpu.matmul %7, %8, %cst {dimension_numbers = #tpu.dot_dimension_numbers<[1], [0], [0], [1], [0, 0, 1, 1], [], []>} : vector<8x8xbf16>, vector<8x256xbf16>, vector<8x256xf32> -> vector<8x256xf32>
    %10 = arith.truncf %3 : vector<8x256xf32> to vector<8x256xbf16>
    %cst_10 = arith.constant dense<0.000000e+00> : vector<8x256xf32>
    %11 = tpu.matmul %7, %10, %cst_10 {dimension_numbers = #tpu.dot_dimension_numbers<[1], [0], [0], [1], [0, 0, 1, 1], [], []>} : vector<8x8xbf16>, vector<8x256xbf16>, vector<8x256xf32> -> vector<8x256xf32>
    %cst_11 = arith.constant dense<0.000000e+00> : vector<8xf32>
    %12 = vector.multi_reduction <add>, %9, %cst_11 [1] : vector<8x256xf32> to vector<8xf32>
    %13 = vector.shape_cast %12 : vector<8xf32> to vector<8x1xf32>
    %14 = arith.mulf %9, %9 : vector<8x256xf32>
    %cst_12 = arith.constant dense<0.000000e+00> : vector<8xf32>
    %15 = vector.multi_reduction <add>, %14, %cst_12 [1] : vector<8x256xf32> to vector<8xf32>
    %16 = vector.shape_cast %15 : vector<8xf32> to vector<8x1xf32>
    %cst_13 = arith.constant dense<0.000000e+00> : vector<8xf32>
    %17 = vector.multi_reduction <add>, %11, %cst_13 [1] : vector<8x256xf32> to vector<8xf32>
    %18 = vector.shape_cast %17 : vector<8xf32> to vector<8x1xf32>
    %19 = arith.addf %13, %18 : vector<8x1xf32>
    %20 = arith.mulf %11, %11 : vector<8x256xf32>
    %cst_14 = arith.constant dense<0.000000e+00> : vector<8xf32>
    %21 = vector.multi_reduction <add>, %20, %cst_14 [1] : vector<8x256xf32> to vector<8xf32>
    %22 = vector.shape_cast %21 : vector<8xf32> to vector<8x1xf32>
    %23 = arith.addf %16, %22 : vector<8x1xf32>
    %cst_15 = arith.constant 0.001953125 : f32
    %24 = vector.broadcast %cst_15 : f32 to vector<8x1xf32>
    %25 = arith.mulf %19, %24 : vector<8x1xf32>
    %cst_16 = arith.constant 0.001953125 : f32
    %26 = vector.broadcast %cst_16 : f32 to vector<8x1xf32>
    %27 = arith.mulf %23, %26 : vector<8x1xf32>
    %28 = arith.mulf %25, %25 : vector<8x1xf32>
    %29 = arith.subf %27, %28 : vector<8x1xf32>
    %cst_17 = arith.constant 9.99999974E-6 : f32
    %30 = vector.broadcast %cst_17 : f32 to vector<8x1xf32>
    %31 = arith.addf %29, %30 : vector<8x1xf32>
    %32 = math.rsqrt %31 : vector<8x1xf32>
    %33 = arith.mulf %5, %32 : vector<8x1xf32>
    %34 = arith.mulf %25, %33 : vector<8x1xf32>
    %35 = arith.subf %6, %34 : vector<8x1xf32>
    %36 = vector.broadcast %33 : vector<8x1xf32> to vector<8x256xf32>
    %37 = arith.mulf %9, %36 : vector<8x256xf32>
    %38 = vector.broadcast %35 : vector<8x1xf32> to vector<8x256xf32>
    %39 = arith.addf %37, %38 : vector<8x256xf32>
    %cst_18 = arith.constant 0.000000e+00 : f32
    %40 = vector.broadcast %cst_18 : f32 to vector<8x256xf32>
    %41 = arith.maximumf %39, %40 : vector<8x256xf32>
    %42 = vector.broadcast %33 : vector<8x1xf32> to vector<8x256xf32>
    %43 = arith.mulf %11, %42 : vector<8x256xf32>
    %44 = vector.broadcast %35 : vector<8x1xf32> to vector<8x256xf32>
    %45 = arith.addf %43, %44 : vector<8x256xf32>
    %cst_19 = arith.constant 0.000000e+00 : f32
    %46 = vector.broadcast %cst_19 : f32 to vector<8x256xf32>
    %47 = arith.maximumf %45, %46 : vector<8x256xf32>
    %c0_20 = arith.constant 0 : index
    %c0_21 = arith.constant 0 : index
    %48 = vector.load %arg4[%c0_20, %c0_21] : memref<8x8xf32, #tpu.memory_space<vmem>>, vector<8x8xf32>
    %c0_22 = arith.constant 0 : index
    %c0_23 = arith.constant 0 : index
    %49 = vector.load %arg5[%c0_22, %c0_23] : memref<8x1xf32, #tpu.memory_space<vmem>>, vector<8x1xf32>
    %c0_24 = arith.constant 0 : index
    %c0_25 = arith.constant 0 : index
    %50 = vector.load %arg6[%c0_24, %c0_25] : memref<8x1xf32, #tpu.memory_space<vmem>>, vector<8x1xf32>
    %51 = arith.truncf %48 : vector<8x8xf32> to vector<8x8xbf16>
    %52 = arith.truncf %41 : vector<8x256xf32> to vector<8x256xbf16>
    %cst_26 = arith.constant dense<0.000000e+00> : vector<8x256xf32>
    %53 = tpu.matmul %51, %52, %cst_26 {dimension_numbers = #tpu.dot_dimension_numbers<[1], [0], [0], [1], [0, 0, 1, 1], [], []>} : vector<8x8xbf16>, vector<8x256xbf16>, vector<8x256xf32> -> vector<8x256xf32>
    %54 = arith.truncf %47 : vector<8x256xf32> to vector<8x256xbf16>
    %cst_27 = arith.constant dense<0.000000e+00> : vector<8x256xf32>
    %55 = tpu.matmul %51, %54, %cst_27 {dimension_numbers = #tpu.dot_dimension_numbers<[1], [0], [0], [1], [0, 0, 1, 1], [], []>} : vector<8x8xbf16>, vector<8x256xbf16>, vector<8x256xf32> -> vector<8x256xf32>
    %cst_28 = arith.constant dense<0.000000e+00> : vector<8xf32>
    %56 = vector.multi_reduction <add>, %53, %cst_28 [1] : vector<8x256xf32> to vector<8xf32>
    %57 = vector.shape_cast %56 : vector<8xf32> to vector<8x1xf32>
    %58 = arith.mulf %53, %53 : vector<8x256xf32>
    %cst_29 = arith.constant dense<0.000000e+00> : vector<8xf32>
    %59 = vector.multi_reduction <add>, %58, %cst_29 [1] : vector<8x256xf32> to vector<8xf32>
    %60 = vector.shape_cast %59 : vector<8xf32> to vector<8x1xf32>
    %cst_30 = arith.constant dense<0.000000e+00> : vector<8xf32>
    %61 = vector.multi_reduction <add>, %55, %cst_30 [1] : vector<8x256xf32> to vector<8xf32>
    %62 = vector.shape_cast %61 : vector<8xf32> to vector<8x1xf32>
    %63 = arith.addf %57, %62 : vector<8x1xf32>
    %64 = arith.mulf %55, %55 : vector<8x256xf32>
    %cst_31 = arith.constant dense<0.000000e+00> : vector<8xf32>
    %65 = vector.multi_reduction <add>, %64, %cst_31 [1] : vector<8x256xf32> to vector<8xf32>
    %66 = vector.shape_cast %65 : vector<8xf32> to vector<8x1xf32>
    %67 = arith.addf %60, %66 : vector<8x1xf32>
    %cst_32 = arith.constant 0.001953125 : f32
    %68 = vector.broadcast %cst_32 : f32 to vector<8x1xf32>
    %69 = arith.mulf %63, %68 : vector<8x1xf32>
    %cst_33 = arith.constant 0.001953125 : f32
    %70 = vector.broadcast %cst_33 : f32 to vector<8x1xf32>
    %71 = arith.mulf %67, %70 : vector<8x1xf32>
    %72 = arith.mulf %69, %69 : vector<8x1xf32>
    %73 = arith.subf %71, %72 : vector<8x1xf32>
    %cst_34 = arith.constant 9.99999974E-6 : f32
    %74 = vector.broadcast %cst_34 : f32 to vector<8x1xf32>
    %75 = arith.addf %73, %74 : vector<8x1xf32>
    %76 = math.rsqrt %75 : vector<8x1xf32>
    %77 = arith.mulf %49, %76 : vector<8x1xf32>
    %78 = arith.mulf %69, %77 : vector<8x1xf32>
    %79 = arith.subf %50, %78 : vector<8x1xf32>
    %80 = vector.broadcast %77 : vector<8x1xf32> to vector<8x256xf32>
    %81 = arith.mulf %53, %80 : vector<8x256xf32>
    %82 = vector.broadcast %79 : vector<8x1xf32> to vector<8x256xf32>
    %83 = arith.addf %81, %82 : vector<8x256xf32>
    %cst_35 = arith.constant 0.000000e+00 : f32
    %84 = vector.broadcast %cst_35 : f32 to vector<8x256xf32>
    %85 = arith.maximumf %83, %84 : vector<8x256xf32>
    %86 = vector.broadcast %77 : vector<8x1xf32> to vector<8x256xf32>
    %87 = arith.mulf %55, %86 : vector<8x256xf32>
    %88 = vector.broadcast %79 : vector<8x1xf32> to vector<8x256xf32>
    %89 = arith.addf %87, %88 : vector<8x256xf32>
    %cst_36 = arith.constant 0.000000e+00 : f32
    %90 = vector.broadcast %cst_36 : f32 to vector<8x256xf32>
    %91 = arith.maximumf %89, %90 : vector<8x256xf32>
    %c0_37 = arith.constant 0 : index
    %c0_38 = arith.constant 0 : index
    %c0_39 = arith.constant 0 : index
    %92 = vector.load %arg7[%c0_37, %c0_38, %c0_39] : memref<2x8x256xf32, #tpu.memory_space<vmem>>, vector<1x8x256xf32>
    %93 = vector.shape_cast %92 : vector<1x8x256xf32> to vector<8x256xf32>
    %94 = arith.addf %85, %93 : vector<8x256xf32>
    %c0_40 = arith.constant 0 : index
    %c0_41 = arith.constant 0 : index
    %c0_42 = arith.constant 0 : index
    %95 = vector.load %arg8[%c0_40, %c0_41, %c0_42] : memref<2x8x256xf32, #tpu.memory_space<vmem>>, vector<1x8x256xf32>
    %96 = vector.shape_cast %95 : vector<1x8x256xf32> to vector<8x256xf32>
    %97 = vector.shape_cast %94 : vector<8x256xf32> to vector<1x8x256xf32>
    tpu.vector_store %arg8[%c0_40, %c0_41, %c0_42], %97 {strides = array<i32>} : memref<2x8x256xf32, #tpu.memory_space<vmem>>, vector<1x8x256xf32>,
    %c1_43 = arith.constant 1 : index
    %c0_44 = arith.constant 0 : index
    %c0_45 = arith.constant 0 : index
    %98 = vector.load %arg7[%c1_43, %c0_44, %c0_45] : memref<2x8x256xf32, #tpu.memory_space<vmem>>, vector<1x8x256xf32>
    %99 = vector.shape_cast %98 : vector<1x8x256xf32> to vector<8x256xf32>
    %100 = arith.addf %91, %99 : vector<8x256xf32>
    %c1_46 = arith.constant 1 : index
    %c0_47 = arith.constant 0 : index
    %c0_48 = arith.constant 0 : index
    %101 = vector.load %arg8[%c1_46, %c0_47, %c0_48] : memref<2x8x256xf32, #tpu.memory_space<vmem>>, vector<1x8x256xf32>
    %102 = vector.shape_cast %101 : vector<1x8x256xf32> to vector<8x256xf32>
    %103 = vector.shape_cast %100 : vector<8x256xf32> to vector<1x8x256xf32>
    tpu.vector_store %arg8[%c1_46, %c0_47, %c0_48], %103 {strides = array<i32>} : memref<2x8x256xf32, #tpu.memory_space<vmem>>, vector<1x8x256xf32>,
    return
  }
}

</mosaic_0001>

<bundles_post_ra>
// kernel: tpu_custom_call.1
= control target key start
LH: loop header
LB: loop body
LE: loop exit
PB: predicated region body
PF: predicated region fallthrough
CT: control target
= control target key end

     0   :  { %13 = vsyncpa [#allocation3], 0  ;;  %s572_s0 = inlined_call_operand.hbm [shape: f32[2,8,256], index: 0, kind: input, shape index: {}]   ;;  %s573_s1 = inlined_call_operand.vmem [shape: f32[8,8], index: 1, kind: input, shape index: {}]   ;;  %s574_s2 = inlined_call_operand.vmem [shape: f32[8,1], index: 2, kind: input, shape index: {}]   ;;  %s575_s3 = inlined_call_operand.vmem [shape: f32[8,1], index: 3, kind: input, shape index: {}]   ;;  %s576_s4 = inlined_call_operand.vmem [shape: f32[8,8], index: 4, kind: input, shape index: {}]   ;;  %s577_s5 = inlined_call_operand.vmem [shape: f32[8,1], index: 5, kind: input, shape index: {}]   ;;  %s578_s6 = inlined_call_operand.vmem [shape: f32[8,1], index: 6, kind: input, shape index: {}]   ;;  %s579_s7 = inlined_call_operand.hbm [shape: f32[2,8,256], index: 7, kind: input, shape index: {}]   ;;  %s580_s8 = inlined_call_operand.hbm [shape: f32[2,8,256], index: 8, kind: output, shape index: {}]  }
   0x1   :  { %14 = vsyncpa [#allocation6], 0 }
   0x2   :  { %15 = vsyncpa [#allocation4], 0  ;;  %s20_s29 = sshll.u32 %s572_s0, 4  ;;  %s469_s30 = smov [#allocation2]   ;;  %s21_s29 = int_to_ptr.hbm [resolvable:$true] %s20_s29 }
   0x3   :  { %s22_s9 = sshll.u32 %s469_s30, 4  ;;  %s45_s12 = sshll.u32 %s579_s7, 4  ;;  %s23_s9 = int_to_ptr.vmem [resolvable:$true] %s22_s9  ;;  %s46_s12 = int_to_ptr.hbm [resolvable:$true] %s45_s12 }
   0x4   :  { %s470_s13 = smov 256   ;;  %s471_s14 = smov 16  }
   0x5   :  { %28 = dma.hbm_to_vmem [thread:$0]  %s21_s29, 512, %s23_s9, [#allocation3], %s470_s13, %s470_s13, %s471_s14  }
   0x6   :  { %s472_s15 = smov [#allocation5]  }
   0x7   :  { %s47_s16 = sshll.u32 %s472_s15, 4  ;;  %s48_s16 = int_to_ptr.vmem [resolvable:$true] %s47_s16 }
   0x8   :  { %53 = dma.hbm_to_vmem [thread:$0]  %s46_s12, 512, %s48_s16, [#allocation6], %s470_s13, %s470_s13, %s471_s14  }
   0x9   :  { %463 = dma.done.wait [#allocation3], 512  }
   0xa   :  { %464 = vsyncadd [#allocation3], 4294966784 }
   0xb   :  { %465 = dma.done.wait [#allocation6], 512  }
   0xc   :  { %466 = vsyncadd [#allocation6], 4294966784  ;;  %v63_v0 = vld [vmem:[#allocation2] sm:$0xff]  ;;  %vm78_vm0 = vcmask 1043456   ;;  %v64_v1 = vld [vmem:[#allocation2 + $0x8] sm:$0xff]  ;;  %vm74_vm1 = vcmask 64512  }
   0xd   :  { %v66_v2 = vld [vmem:[#allocation2 + $0x10] sm:$0xff]  ;;  %v72_v3 = vpack.c.bf16 %v63_v0, %v63_v0  ;;  %v73_v4 = vpack.c.bf16 %v64_v1, %v64_v1  ;;  %v67_v6 = vld [vmem:[#allocation2 + $0x18] sm:$0xff]  ;;  %v68_v7 = vld [vmem:[%s573_s1] sm:$0xff]  ;;  %v473_v30 = vmov 0   ;;  %s356_s25 = sshll.u32 %s580_s8, 4  ;;  %s357_s25 = int_to_ptr.hbm [resolvable:$true] %s356_s25 }
   0xe   :  { %v111_v5 = vpack.c.bf16 %v66_v2, %v66_v2  ;;  %v112_v8 = vpack.c.bf16 %v67_v6, %v67_v6  ;;  %v71_v12 = vpack.c.bf16 %v68_v7, %v68_v7  ;;  %384 = vset.pattern.permute.xlu2 %v473_v30  ;;  %385 = vset.pattern.permute.xlu1 %v473_v30  ;;  %v69_v47 = vld [vmem:[%s574_s2] sm:$0xff] }
   0xf   :  { %v80_v9 = vsel %vm78_vm0, %v72_v3, 0  ;;  %v83_v10 = vsel %vm78_vm0, %v73_v4, 0  ;;  %386 = vset.pattern.permute.xlu0 %v473_v30  ;;  %v70_v52 = vld [vmem:[%s575_s3] sm:$0xff] }
  0x10   :  { %v114_v11 = vsel %vm78_vm0, %v111_v5, 0  ;;  %92 = vmatpush.bf16.msra.mxu0 %v80_v9  ;;  %105 = vmatpush.bf16.msra.mxu1 %v83_v10  ;;  %v117_v13 = vsel %vm78_vm0, %v112_v8, 0  ;;  %v203_v4 = vld [vmem:[%s576_s4] sm:$0xff] }
  0x11   :  { %126 = vmatpush.bf16.msra.mxu2 %v114_v11  ;;  %139 = vmatpush.bf16.msra.mxu3 %v117_v13  ;;  %v206_v9 = vpack.c.bf16 %v203_v4, %v203_v4 }
  0x13   :  { %370 = vmatmul.msk.bf16.vlgmr.msra.gmra.mxu0 %vm74_vm1, %v71_v12  ;;  %371 = vmatmul.msk.bf16.vlgmr.msra.gmra.mxu1 %vm74_vm1, %v71_v12 }
  0x14   :  { %372 = vmatmul.msk.bf16.vlgmr.msra.gmra.mxu2 %vm74_vm1, %v71_v12  ;;  %373 = vmatmul.msk.bf16.vlgmr.msra.gmra.mxu3 %vm74_vm1, %v71_v12 }
  0x90   :  { %v94_v14 = vpop.f32.mrf.mxu0  ;;  %v107_v15 = vpop.f32.mrf.mxu1 }
  0x91   :  { %v145_v16 = vadd.f32 %v107_v15, %v94_v14  ;;  %v148_v17 = vmul.f32 %v94_v14, %v94_v14  ;;  %v149_v18 = vmul.f32 %v107_v15, %v107_v15 }
  0x93   :  { %146 = vadd.xlane.f32.xlu0 %v145_v16  ;;  %v150_v19 = vadd.f32 %v149_v18, %v148_v17 }
  0x95   :  { %151 = vadd.xlane.f32.xlu1 %v150_v19 }
  0x97   :  { %v128_v20 = vpop.f32.mrf.mxu2  ;;  %v141_v21 = vpop.f32.mrf.mxu3 }
  0x98   :  { %v96_v22 = vpop.f32.mrf.mxu0  ;;  %v109_v23 = vpop.f32.mrf.mxu1  ;;  %v153_v24 = vadd.f32 %v141_v21, %v128_v20  ;;  %v157_v25 = vmul.f32 %v128_v20, %v128_v20  ;;  %v158_v26 = vmul.f32 %v141_v21, %v141_v21 }
  0x9a   :  { %v159_v27 = vadd.f32 %v158_v26, %v157_v25 }
  0x9b   :  { %154 = vadd.xlane.f32.xlu0 %v153_v24 }
  0x9d   :  { %160 = vadd.xlane.f32.xlu1 %v159_v27 }
  0x9f   :  { %v130_v28 = vpop.f32.mrf.mxu2  ;;  %v143_v29 = vpop.f32.mrf.mxu3 }
 0x106   :  { %v147_v31 = vpop.xlane.xlu0 %146 }
 0x108   :  { %v152_v32 = vpop.xlane.xlu1 %151 }
 0x10e   :  { %v155_v33 = vpop.xlane.xlu0 %154 }
 0x10f   :  { %v156_v34 = vadd.f32 %v155_v33, %v147_v31 }
 0x110   :  { %v161_v35 = vpop.xlane.xlu1 %160 }
 0x111   :  { %v163_v36 = vmul.f32 0.001953125, %v156_v34  ;;  %v162_v37 = vadd.f32 %v161_v35, %v152_v32 }
 0x113   :  { %v165_v38 = vmul.f32 %v163_v36, %v163_v36  ;;  %v164_v39 = vmul.f32 0.001953125, %v162_v37 }
 0x115   :  { %v166_v40 = vsub.f32 %v164_v39, %v165_v38 }
 0x117   :  { %v167_v41 = vadd.f32 1e-05, %v166_v40 }
 0x119   :  { %387 = vrsqrt.f32 %v167_v41  ;;  %vm174_vm3 = vweird.f32 %v167_v41 }
 0x11f   :  { %v388_v42 = vpop.eup %387 }
 0x120   :  { %v169_v43 = vmul.f32 %v388_v42, %v167_v41  ;;  %vm175_vm2 = vweird.f32 %v388_v42 }
 0x121   :  { %vm176_vm4 = vmor %vm174_vm3, %vm175_vm2 }
 0x122   :  { %v170_v44 = vmul.f32 %v388_v42, %v169_v43 }
 0x124   :  { %v171_v45 = vmul.f32 0.5, %v170_v44 }
 0x126   :  { %v172_v46 = vsub.f32 1.5, %v171_v45 }
 0x128   :  { %v173_v48 = vmul.f32 %v388_v42, %v172_v46  ;;  %v204_v46 = vld [vmem:[%s577_s5] sm:$0xff]  ;;  %s474_s5 = smov [#allocation7]  }
 0x12a   :  { %v177_v49 = vsel %vm176_vm4, %v388_v42, %v173_v48 }
 0x12b   :  { %v178_v50 = vmul.f32 %v177_v49, %v69_v47 }
 0x12d   :  { %183 = vperm.xlu2 %384, %v178_v50   ;;  %v179_v51 = vmul.f32 %v178_v50, %v163_v36  ;;  %v205_v50 = vld [vmem:[%s578_s6] sm:$0xff]  ;;  %s354_s6 = sshll.u32 %s474_s5, 4  ;;  %s355_s6 = int_to_ptr.vmem [resolvable:$true] %s354_s6 }
 0x12f   :  { %v180_v53 = vsub.f32 %v70_v52, %v179_v51 }
 0x135   :  { %190 = vperm.xlu2 %384, %v180_v53  }
 0x187   :  { %v184_v54 = vpop.permute.xlu2 %183 }
 0x188   :  { %v186_v55 = vmul.f32 %v184_v54, %v94_v14  ;;  %v187_v56 = vmul.f32 %v184_v54, %v107_v15  ;;  %v197_v57 = vmul.f32 %v184_v54, %v128_v20  ;;  %v198_v58 = vmul.f32 %v184_v54, %v141_v21 }
 0x18f   :  { %v191_v59 = vpop.permute.xlu2 %190 }
 0x190   :  { %v193_v60 = vadd.f32 %v191_v59, %v186_v55  ;;  %v194_v61 = vadd.f32 %v191_v59, %v187_v56  ;;  %v199_v62 = vadd.f32 %v197_v57, %v191_v59  ;;  %v200_v63 = vadd.f32 %v198_v58, %v191_v59 }
 0x192   :  { %v195_v0 = vmax.f32 %v193_v60, 0.0  ;;  %v196_v1 = vmax.f32 %v194_v61, 0.0  ;;  %v201_v2 = vmax.f32 %v199_v62, 0.0  ;;  %v202_v3 = vmax.f32 %v200_v63, 0.0  ;;  %v336_v63 = vld [vmem:[#allocation5] sm:$0xff] }
 0x194   :  { %v207_v5 = vpack.c.bf16 %v195_v0, %v195_v0  ;;  %v208_v6 = vpack.c.bf16 %v196_v1, %v196_v1  ;;  %v244_v7 = vpack.c.bf16 %v201_v2, %v201_v2  ;;  %v245_v8 = vpack.c.bf16 %v202_v3, %v202_v3  ;;  %v337_v0 = vld [vmem:[#allocation5 + $0x8] sm:$0xff]  ;;  %v343_v1 = vld [vmem:[#allocation5 + $0x10] sm:$0xff]  ;;  %v344_v2 = vld [vmem:[#allocation5 + $0x18] sm:$0xff] }
 0x196   :  { %v213_v10 = vsel %vm78_vm0, %v207_v5, 0  ;;  %v216_v11 = vsel %vm78_vm0, %v208_v6, 0  ;;  %v247_v12 = vsel %vm78_vm0, %v244_v7, 0  ;;  %v250_v13 = vsel %vm78_vm0, %v245_v8, 0 }
 0x197   :  { %225 = vmatpush.bf16.msrb.mxu0 %v213_v10  ;;  %238 = vmatpush.bf16.msrb.mxu1 %v216_v11 }
 0x198   :  { %259 = vmatpush.bf16.msrb.mxu2 %v247_v12  ;;  %272 = vmatpush.bf16.msrb.mxu3 %v250_v13 }
 0x19a   :  { %374 = vmatmul.msk.bf16.vlgmr.msrb.gmra.mxu0 %vm74_vm1, %v206_v9  ;;  %375 = vmatmul.msk.bf16.vlgmr.msrb.gmra.mxu1 %vm74_vm1, %v206_v9 }
 0x19b   :  { %376 = vmatmul.msk.bf16.vlgmr.msrb.gmra.mxu2 %vm74_vm1, %v206_v9  ;;  %377 = vmatmul.msk.bf16.vlgmr.msrb.gmra.mxu3 %vm74_vm1, %v206_v9 }
 0x217   :  { %v227_v14 = vpop.f32.mrf.mxu0  ;;  %v240_v15 = vpop.f32.mrf.mxu1 }
 0x218   :  { %v278_v16 = vadd.f32 %v240_v15, %v227_v14  ;;  %v281_v17 = vmul.f32 %v227_v14, %v227_v14  ;;  %v282_v18 = vmul.f32 %v240_v15, %v240_v15 }
 0x21a   :  { %279 = vadd.xlane.f32.xlu0 %v278_v16  ;;  %v283_v19 = vadd.f32 %v282_v18, %v281_v17 }
 0x21c   :  { %284 = vadd.xlane.f32.xlu2 %v283_v19 }
 0x21e   :  { %v261_v20 = vpop.f32.mrf.mxu2  ;;  %v274_v21 = vpop.f32.mrf.mxu3 }
 0x21f   :  { %v286_v22 = vadd.f32 %v274_v21, %v261_v20  ;;  %v290_v23 = vmul.f32 %v261_v20, %v261_v20  ;;  %v291_v24 = vmul.f32 %v274_v21, %v274_v21  ;;  %v229_v25 = vpop.f32.mrf.mxu0  ;;  %v242_v26 = vpop.f32.mrf.mxu1 }
 0x221   :  { %287 = vadd.xlane.f32.xlu1 %v286_v22  ;;  %v292_v27 = vadd.f32 %v291_v24, %v290_v23 }
 0x223   :  { %293 = vadd.xlane.f32.xlu0 %v292_v27 }
 0x226   :  { %v263_v28 = vpop.f32.mrf.mxu2  ;;  %v276_v29 = vpop.f32.mrf.mxu3 }
 0x28d   :  { %v280_v30 = vpop.xlane.xlu0 %279 }
 0x28f   :  { %v285_v33 = vpop.xlane.xlu2 %284 }
 0x294   :  { %v288_v31 = vpop.xlane.xlu1 %287 }
 0x295   :  { %v289_v32 = vadd.f32 %v288_v31, %v280_v30 }
 0x296   :  { %v294_v34 = vpop.xlane.xlu0 %293 }
 0x297   :  { %v296_v35 = vmul.f32 0.001953125, %v289_v32  ;;  %v295_v36 = vadd.f32 %v294_v34, %v285_v33 }
 0x299   :  { %v298_v37 = vmul.f32 %v296_v35, %v296_v35  ;;  %v297_v38 = vmul.f32 0.001953125, %v295_v36 }
 0x29b   :  { %v299_v39 = vsub.f32 %v297_v38, %v298_v37 }
 0x29d   :  { %v300_v40 = vadd.f32 1e-05, %v299_v39 }
 0x29f   :  { %389 = vrsqrt.f32 %v300_v40  ;;  %vm307_vm6 = vweird.f32 %v300_v40 }
 0x2a5   :  { %v390_v41 = vpop.eup %389 }
 0x2a6   :  { %v302_v42 = vmul.f32 %v390_v41, %v300_v40  ;;  %vm308_vm5 = vweird.f32 %v390_v41 }
 0x2a7   :  { %vm309_vm7 = vmor %vm307_vm6, %vm308_vm5 }
 0x2a8   :  { %v303_v43 = vmul.f32 %v390_v41, %v302_v42 }
 0x2aa   :  { %v304_v44 = vmul.f32 0.5, %v303_v43 }
 0x2ac   :  { %v305_v45 = vsub.f32 1.5, %v304_v44 }
 0x2ae   :  { %v306_v47 = vmul.f32 %v390_v41, %v305_v45 }
 0x2b0   :  { %v310_v48 = vsel %vm309_vm7, %v390_v41, %v306_v47 }
 0x2b1   :  { %v311_v49 = vmul.f32 %v310_v48, %v204_v46 }
 0x2b3   :  { %316 = vperm.xlu1 %385, %v311_v49   ;;  %v312_v51 = vmul.f32 %v311_v49, %v296_v35 }
 0x2b5   :  { %v313_v52 = vsub.f32 %v205_v50, %v312_v51 }
 0x2b7   :  { %323 = vperm.xlu0 %386, %v313_v52  }
 0x325   :  { %v317_v53 = vpop.permute.xlu1 %316 }
 0x326   :  { %v319_v54 = vmul.f32 %v317_v53, %v227_v14  ;;  %v320_v55 = vmul.f32 %v317_v53, %v240_v15  ;;  %v330_v56 = vmul.f32 %v317_v53, %v261_v20  ;;  %v331_v57 = vmul.f32 %v317_v53, %v274_v21 }
 0x329   :  { %v324_v58 = vpop.permute.xlu0 %323 }
 0x32a   :  { %v326_v59 = vadd.f32 %v324_v58, %v319_v54  ;;  %v327_v60 = vadd.f32 %v324_v58, %v320_v55  ;;  %v332_v61 = vadd.f32 %v330_v56, %v324_v58  ;;  %v333_v62 = vadd.f32 %v331_v57, %v324_v58 }
 0x32c   :  { %v328_v3 = vmax.f32 %v326_v59, 0.0  ;;  %v329_v4 = vmax.f32 %v327_v60, 0.0  ;;  %v334_v5 = vmax.f32 %v332_v61, 0.0  ;;  %v335_v6 = vmax.f32 %v333_v62, 0.0 }
 0x32e   :  { %v338_v7 = vadd.f32 %v336_v63, %v328_v3  ;;  %v339_v8 = vadd.f32 %v337_v0, %v329_v4  ;;  %v345_v9 = vadd.f32 %v343_v1, %v334_v5  ;;  %v346_v10 = vadd.f32 %v344_v2, %v335_v6 }
 0x330   :  { %340 = vst [vmem:[#allocation7] sm:$0xff] %v338_v7 }
 0x331   :  { %341 = vst [vmem:[#allocation7 + $0x8] sm:$0xff] %v339_v8 }
 0x332   :  { %348 = vst [vmem:[#allocation7 + $0x10] sm:$0xff] %v345_v9 }
 0x333   :  { %349 = vst [vmem:[#allocation7 + $0x18] sm:$0xff] %v346_v10 }
 0x334   :  { %362 = dma.vmem_to_hbm [thread:$0]  %s355_s6, 512, %s357_s25, [#allocation4], %s470_s13, %s470_s13, %s471_s14  }
 0x335   :  { %467 = dma.done.wait [#allocation4], 512  }
 0x336   :  { %468 = vsyncadd [#allocation4], 4294966784 }
 0x337   :  { %367 = vsyncpa [#allocation3], 1 }
 0x338   :  { %368 = vsyncpa [#allocation6], 1 }
 0x339   :  { %369 = vsyncpa [#allocation4], 1 }

</bundles_post_ra>
